<compile_context>
chip_gen: v7x
topology: tpu7x:2x2x1
jax: 0.10.0
libtpu: 0.0.40
codegen_flags: <defaults>
</compile_context>

<pallas_src>
import functools
import math

import jax
import jax.numpy as jnp
from jax import lax
from jax.experimental import pallas as pl
from jax.experimental.pallas import tpu as pltpu


def _causal_attn_kernel(x_ref, wq_ref, wk_ref, wv_ref, o_ref, *, fold_batch, tq):
    Bb, T, D_IN = x_ref.shape
    D_OUT = wq_ref.shape[1]
    op_dtype = x_ref.dtype  # narrow MXU operand dtype (bf16 when inputs are bf16)

    x = x_ref[...]
    wq = wq_ref[...]
    wk = wk_ref[...]
    wv = wv_ref[...]

    # --- QKV projections (query weights are pre-scaled by 1/sqrt(d_out)) -----
    if fold_batch:
        # T is sublane-aligned for this dtype, so merging (Bb, T) is layout-free
        # and the MXU sees a single (Bb*T, D_IN) x (D_IN, D_OUT) matmul.
        x2 = x.reshape(Bb * T, D_IN)
        q = jnp.dot(x2, wq, preferred_element_type=jnp.float32).reshape(Bb, T, D_OUT)
        k = jnp.dot(x2, wk, preferred_element_type=jnp.float32).reshape(Bb, T, D_OUT)
        v = jnp.dot(x2, wv, preferred_element_type=jnp.float32).reshape(Bb, T, D_OUT)
    else:
        # Layout-free batched projection (no reshape / VMEM copy).
        q = jnp.einsum("btd,df->btf", x, wq, preferred_element_type=jnp.float32)
        k = jnp.einsum("btd,df->btf", x, wk, preferred_element_type=jnp.float32)
        v = jnp.einsum("btd,df->btf", x, wv, preferred_element_type=jnp.float32)

    # MXU-native operand dtype for the attention matmuls; accumulation stays f32.
    q = q.astype(op_dtype)
    k = k.astype(op_dtype)
    v = v.astype(op_dtype)

    n_q = T // tq
    # Diagonal-tile causal mask (tq == tk): strict upper triangle -> -inf.
    row = lax.broadcasted_iota(jnp.int32, (tq, tq), 0)
    col = lax.broadcasted_iota(jnp.int32, (tq, tq), 1)
    diag_mask = (col > row)[None, :, :]

    # Static (unrolled) tile loops; tile counts are small (T/tq <= a few dozen).
    for qi in range(n_q):
        q_t = q[:, qi * tq:(qi + 1) * tq, :]                       # (Bb, tq, D_OUT)
        m = jnp.full((Bb, tq, 1), -jnp.inf, jnp.float32)
        l = jnp.zeros((Bb, tq, 1), jnp.float32)
        acc = jnp.zeros((Bb, tq, D_OUT), jnp.float32)

        for kj in range(qi + 1):  # causal: skip fully-masked KV tiles above the diagonal
            k_t = k[:, kj * tq:(kj + 1) * tq, :]
            v_t = v[:, kj * tq:(kj + 1) * tq, :]

            s = jnp.einsum("bqd,bkd->bqk", q_t, k_t,
                           preferred_element_type=jnp.float32)     # (Bb, tq, tq)
            if kj == qi:
                # Only the diagonal tile needs masking; every row keeps its
                # diagonal so no fully-masked rows / no 0/0 in the softmax.
                s = jnp.where(diag_mask, -jnp.inf, s)

            m_new = jnp.maximum(m, jnp.max(s, axis=-1, keepdims=True))
            alpha = jnp.exp(m - m_new)
            p = jnp.exp(s - m_new)
            l = alpha * l + jnp.sum(p, axis=-1, keepdims=True)
            acc = alpha * acc + jnp.einsum("bqk,bkd->bqd", p.astype(op_dtype), v_t,
                                           preferred_element_type=jnp.float32)
            m = m_new

        # Dropout on attention weights: eval-mode identity.
        o_ref[:, qi * tq:(qi + 1) * tq, :] = (acc / l).astype(o_ref.dtype)


def _choose_batch_block(B, T, max_rows=1024):
    """Batch fold per grid step, bounded by a row budget; >=2 grid steps when B >= 2
    so both v7x TensorCores are used."""
    Bb = max(1, min(B, max_rows // max(T, 1)))
    if B >= 2:
        Bb = min(Bb, max(1, B // 2))
    return Bb


def _choose_q_tile(T, sublane, max_tile=256):
    """Largest sublane-aligned divisor of T that is <= max_tile; single tile otherwise."""
    if T <= max_tile:
        return T
    best = T
    t = sublane
    while t <= max_tile:
        if T % t == 0:
            best = t
        t += sublane
    return best


def _vmem_limit_bytes(Bb, T, D_IN, D_OUT, tq, itemsize):
    f32 = 4
    x_blk = 2 * Bb * T * D_IN * itemsize            # double-buffered input block
    o_blk = 2 * Bb * T * D_OUT * itemsize           # double-buffered output block
    w_blk = 3 * 2 * D_IN * D_OUT * itemsize         # weights (double-buffered)
    qkv = 3 * Bb * T * D_OUT * (f32 + itemsize)     # f32 projections + narrow casts
    attn = Bb * tq * (2 * tq + 2 * D_OUT + 8) * f32  # scores, p, acc, m/l/alpha
    est = x_blk + o_blk + w_blk + qkv + attn
    # Generous headroom, clamped into a range valid on all generations
    # (v7x only has 64 MiB of VMEM per TensorCore).
    return int(min(max(2 * est, 16 * 1024 * 1024), 64 * 1024 * 1024))


def causal_attention(x, wq, wk, wv, *, max_rows=1024, max_q_tile=256):
    """x: (B, T, D_IN); wq/wk/wv: (D_OUT, D_IN) nn.Linear weights (qkv_bias=False).

    Returns softmax(causal_mask((xWq^T)(xWk^T)^T) / sqrt(D_OUT)) @ (xWv^T),
    shape (B, T, D_OUT).
    """
    B, T, D_IN = x.shape
    D_OUT = wq.shape[0]
    scale = 1.0 / math.sqrt(D_OUT)

    # One-time wrapper-side prep (plain XLA, outside the kernel):
    #  - transpose to (D_IN, D_OUT) so the kernel does x @ Wt (no in-kernel .T)
    #  - fold the 1/sqrt(d_out) score scale into Wq (applied in the weights'
    #    own dtype before the cast, so bf16 inputs don't round the scale twice)
    #  - cast to x.dtype so the MXU sees narrow operands when x is bf16.
    wq_t = (wq.T * jnp.asarray(scale, wq.dtype)).astype(x.dtype)
    wk_t = wk.T.astype(x.dtype)
    wv_t = wv.T.astype(x.dtype)

    itemsize = jnp.dtype(x.dtype).itemsize
    sublane = max(8, 32 // itemsize)                # 8 rows/vreg f32, 16 bf16

    Bb = _choose_batch_block(B, T, max_rows)
    tq = _choose_q_tile(T, sublane, max_q_tile)
    fold_batch = (T % sublane == 0)

    grid = (pl.cdiv(B, Bb),)
    kernel = functools.partial(_causal_attn_kernel, fold_batch=fold_batch, tq=tq)

    out = pl.pallas_call(
        kernel,
        out_shape=jax.ShapeDtypeStruct((B, T, D_OUT), x.dtype),
        grid_spec=pltpu.PrefetchScalarGridSpec(
            num_scalar_prefetch=0,
            grid=grid,
            in_specs=[
                pl.BlockSpec((Bb, T, D_IN), lambda b: (b, 0, 0)),
                pl.BlockSpec((D_IN, D_OUT), lambda b: (0, 0)),
                pl.BlockSpec((D_IN, D_OUT), lambda b: (0, 0)),
                pl.BlockSpec((D_IN, D_OUT), lambda b: (0, 0)),
            ],
            out_specs=pl.BlockSpec((Bb, T, D_OUT), lambda b: (b, 0, 0)),
        ),
        compiler_params=pltpu.CompilerParams(
            dimension_semantics=("parallel",),
            vmem_limit_bytes=_vmem_limit_bytes(Bb, T, D_IN, D_OUT, tq, itemsize),
        ),
    )(x, wq_t, wk_t, wv_t)
    return out


def _reference(x, wq, wk, wv):
    q = jnp.einsum("btd,od->bto", x, wq)
    k = jnp.einsum("btd,od->bto", x, wk)
    v = jnp.einsum("btd,od->bto", x, wv)
    scores = jnp.einsum("bqo,bko->bqk", q, k)
    T = x.shape[1]
    mask = jnp.triu(jnp.ones((T, T), bool), k=1)
    scores = jnp.where(mask[None], -jnp.inf, scores)
    w = jax.nn.softmax(scores / jnp.sqrt(jnp.float32(wq.shape[0])), axis=-1)
    return jnp.einsum("bqk,bko->bqo", w, v)


if __name__ == "__main__":
    B, T, D_IN, D_OUT = 2, 8, 32, 32  # context_length >= T; d_in=32, d_out=32

    key = jax.random.PRNGKey(0)
    kx, kq, kk, kv = jax.random.split(key, 4)

    x = jax.random.normal(kx, (B, T, D_IN), dtype=jnp.float32)
    # Deterministic "Linear" weights (qkv_bias=False), nn.Linear shape (d_out, d_in)
    bound = 1.0 / math.sqrt(D_IN)
    wq = jax.random.uniform(kq, (D_OUT, D_IN), jnp.float32, -bound, bound)
    wk = jax.random.uniform(kk, (D_OUT, D_IN), jnp.float32, -bound, bound)
    wv = jax.random.uniform(kv, (D_OUT, D_IN), jnp.float32, -bound, bound)

    out = causal_attention(x, wq, wk, wv)
    out = jax.block_until_ready(out)

    ref = _reference(x, wq, wk, wv)
    assert out.shape == (B, T, D_OUT)
    # Tolerance covers TPU matmul accumulation-order differences vs. the XLA reference.
    assert jnp.allclose(out, ref, atol=2e-3, rtol=2e-3), "mismatch vs reference"

    print("KERNEL_OK")
</pallas_src>

<mosaic_0001>
module attributes {stable_mosaic.version = 11 : i64} {
  func.func @_causal_attn_kernel(%arg0: i32, %arg1: memref<1x8x32xf32, #tpu.memory_space<vmem>>, %arg2: memref<32x32xf32, #tpu.memory_space<vmem>>, %arg3: memref<32x32xf32, #tpu.memory_space<vmem>>, %arg4: memref<32x32xf32, #tpu.memory_space<vmem>>, %arg5: memref<1x8x32xf32, #tpu.memory_space<vmem>>) attributes {dimension_semantics = [#tpu.dimension_semantics<parallel>], iteration_bounds = array<i64: 2>, scalar_prefetch = 0 : i64, scratch_operands = 0 : i64, tpu.core_type = #tpu.core_type<tc>, window_params = [{transform_indices = @transform_0, window_bounds = array<i64: 1, 8, 32>}, {pipeline_mode = #tpu.pipeline_mode<synchronous>, transform_indices = @transform_1, window_bounds = array<i64: 32, 32>}, {pipeline_mode = #tpu.pipeline_mode<synchronous>, transform_indices = @transform_2, window_bounds = array<i64: 32, 32>}, {pipeline_mode = #tpu.pipeline_mode<synchronous>, transform_indices = @transform_3, window_bounds = array<i64: 32, 32>}, {transform_indices = @transform_4, window_bounds = array<i64: 1, 8, 32>}]} {
    %c0 = arith.constant 0 : index
    %c0_0 = arith.constant 0 : index
    %c0_1 = arith.constant 0 : index
    %0 = vector.load %arg1[%c0, %c0_0, %c0_1] : memref<1x8x32xf32, #tpu.memory_space<vmem>>, vector<1x8x32xf32>
    %c0_2 = arith.constant 0 : index
    %c0_3 = arith.constant 0 : index
    %1 = vector.load %arg2[%c0_2, %c0_3] : memref<32x32xf32, #tpu.memory_space<vmem>>, vector<32x32xf32>
    %c0_4 = arith.constant 0 : index
    %c0_5 = arith.constant 0 : index
    %2 = vector.load %arg3[%c0_4, %c0_5] : memref<32x32xf32, #tpu.memory_space<vmem>>, vector<32x32xf32>
    %c0_6 = arith.constant 0 : index
    %c0_7 = arith.constant 0 : index
    %3 = vector.load %arg4[%c0_6, %c0_7] : memref<32x32xf32, #tpu.memory_space<vmem>>, vector<32x32xf32>
    %4 = vector.shape_cast %0 : vector<1x8x32xf32> to vector<8x32xf32>
    %cst = arith.constant dense<0.000000e+00> : vector<8x32xf32>
    %5 = tpu.matmul %4, %1, %cst {dimension_numbers = #tpu.dot_dimension_numbers<[1], [0], [0], [1], [0, 0, 1, 1], [], []>} : vector<8x32xf32>, vector<32x32xf32>, vector<8x32xf32> -> vector<8x32xf32>
    %6 = vector.shape_cast %5 : vector<8x32xf32> to vector<1x8x32xf32>
    %cst_8 = arith.constant dense<0.000000e+00> : vector<8x32xf32>
    %7 = tpu.matmul %4, %2, %cst_8 {dimension_numbers = #tpu.dot_dimension_numbers<[1], [0], [0], [1], [0, 0, 1, 1], [], []>} : vector<8x32xf32>, vector<32x32xf32>, vector<8x32xf32> -> vector<8x32xf32>
    %8 = vector.shape_cast %7 : vector<8x32xf32> to vector<1x8x32xf32>
    %cst_9 = arith.constant dense<0.000000e+00> : vector<8x32xf32>
    %9 = tpu.matmul %4, %3, %cst_9 {dimension_numbers = #tpu.dot_dimension_numbers<[1], [0], [0], [1], [0, 0, 1, 1], [], []>} : vector<8x32xf32>, vector<32x32xf32>, vector<8x32xf32> -> vector<8x32xf32>
    %10 = vector.shape_cast %9 : vector<8x32xf32> to vector<1x8x32xf32>
    %11 = tpu.iota {dimensions = array<i32: 0>} : vector<8x8xi32>
    %12 = tpu.iota {dimensions = array<i32: 1>} : vector<8x8xi32>
    %13 = arith.cmpi sgt, %12, %11 : vector<8x8xi32>
    %14 = vector.shape_cast %13 : vector<8x8xi1> to vector<1x8x8xi1>
    %cst_10 = arith.constant 0xFF800000 : f32
    %15 = vector.broadcast %cst_10 : f32 to vector<1x8x1xf32>
    %cst_11 = arith.constant 0.000000e+00 : f32
    %16 = vector.broadcast %cst_11 : f32 to vector<1x8x1xf32>
    %cst_12 = arith.constant 0.000000e+00 : f32
    %17 = vector.broadcast %cst_12 : f32 to vector<1x8x32xf32>
    "tpu.trace_start"() <{level = 10 : i32, message = "bqd,bkd->bqk"}> : () -> ()
    %cst_13 = arith.constant dense<0.000000e+00> : vector<1x8x8xf32>
    %18 = tpu.matmul %6, %8, %cst_13 {dimension_numbers = #tpu.dot_dimension_numbers<[2], [2], [1], [1], [0, 0, 0, 1, 1, 1], [0], [0]>} : vector<1x8x32xf32>, vector<1x8x32xf32>, vector<1x8x8xf32> -> vector<1x8x8xf32>
    %cst_14 = arith.constant 0xFF800000 : f32
    "tpu.trace_stop"() : () -> ()
    %19 = vector.broadcast %cst_14 : f32 to vector<1x8x8xf32>
    %20 = arith.select %14, %19, %18 : vector<1x8x8xi1>, vector<1x8x8xf32>
    %cst_15 = arith.constant dense<0xFF800000> : vector<1x8xf32>
    %21 = vector.multi_reduction <maximumf>, %20, %cst_15 [2] : vector<1x8x8xf32> to vector<1x8xf32>
    %22 = vector.shape_cast %21 : vector<1x8xf32> to vector<1x8x1xf32>
    %23 = arith.maximumf %15, %22 : vector<1x8x1xf32>
    %24 = arith.subf %15, %23 : vector<1x8x1xf32>
    %25 = math.exp %24 : vector<1x8x1xf32>
    %26 = vector.broadcast %23 : vector<1x8x1xf32> to vector<1x8x8xf32>
    %27 = arith.subf %20, %26 : vector<1x8x8xf32>
    %28 = math.exp %27 : vector<1x8x8xf32>
    %29 = arith.mulf %25, %16 : vector<1x8x1xf32>
    %cst_16 = arith.constant dense<0.000000e+00> : vector<1x8xf32>
    %30 = vector.multi_reduction <add>, %28, %cst_16 [2] : vector<1x8x8xf32> to vector<1x8xf32>
    %31 = vector.shape_cast %30 : vector<1x8xf32> to vector<1x8x1xf32>
    %32 = arith.addf %29, %31 : vector<1x8x1xf32>
    %33 = vector.broadcast %25 : vector<1x8x1xf32> to vector<1x8x32xf32>
    %34 = arith.mulf %33, %17 : vector<1x8x32xf32>
    "tpu.trace_start"() <{level = 10 : i32, message = "bqk,bkd->bqd"}> : () -> ()
    %cst_17 = arith.constant dense<0.000000e+00> : vector<1x8x32xf32>
    %35 = tpu.matmul %28, %10, %cst_17 {dimension_numbers = #tpu.dot_dimension_numbers<[2], [1], [1], [2], [0, 0, 0, 1, 1, 2], [0], [0]>} : vector<1x8x8xf32>, vector<1x8x32xf32>, vector<1x8x32xf32> -> vector<1x8x32xf32>
    "tpu.trace_stop"() : () -> ()
    %36 = arith.addf %34, %35 : vector<1x8x32xf32>
    %37 = vector.broadcast %32 : vector<1x8x1xf32> to vector<1x8x32xf32>
    %38 = arith.divf %36, %37 : vector<1x8x32xf32>
    %c0_18 = arith.constant 0 : index
    %c0_19 = arith.constant 0 : index
    %c0_20 = arith.constant 0 : index
    %39 = vector.load %arg5[%c0_18, %c0_19, %c0_20] : memref<1x8x32xf32, #tpu.memory_space<vmem>>, vector<1x8x32xf32>
    tpu.vector_store %arg5[%c0_18, %c0_19, %c0_20], %38 {strides = array<i32>} : memref<1x8x32xf32, #tpu.memory_space<vmem>>, vector<1x8x32xf32>,
    return
  }
  func.func @transform_0(%arg0: i32) -> (i32, i32, i32) {
    %c0_i32 = arith.constant 0 : i32
    %c0_i32_0 = arith.constant 0 : i32
    %c0_i32_1 = arith.constant 0 : i32
    return %arg0, %c0_i32, %c0_i32_0 : i32, i32, i32
  }
  func.func @transform_1(%arg0: i32) -> (i32, i32) {
    %c0_i32 = arith.constant 0 : i32
    %c0_i32_0 = arith.constant 0 : i32
    %c0_i32_1 = arith.constant 0 : i32
    return %c0_i32, %c0_i32_0 : i32, i32
  }
  func.func @transform_2(%arg0: i32) -> (i32, i32) {
    %c0_i32 = arith.constant 0 : i32
    %c0_i32_0 = arith.constant 0 : i32
    %c0_i32_1 = arith.constant 0 : i32
    return %c0_i32, %c0_i32_0 : i32, i32
  }
  func.func @transform_3(%arg0: i32) -> (i32, i32) {
    %c0_i32 = arith.constant 0 : i32
    %c0_i32_0 = arith.constant 0 : i32
    %c0_i32_1 = arith.constant 0 : i32
    return %c0_i32, %c0_i32_0 : i32, i32
  }
  func.func @transform_4(%arg0: i32) -> (i32, i32, i32) {
    %c0_i32 = arith.constant 0 : i32
    %c0_i32_0 = arith.constant 0 : i32
    %c0_i32_1 = arith.constant 0 : i32
    return %arg0, %c0_i32, %c0_i32_0 : i32, i32, i32
  }
}

</mosaic_0001>

<bundles_post_ra>
// kernel: tpu_custom_call.1
= control target key start
LH: loop header
LB: loop body
LE: loop exit
PB: predicated region body
PF: predicated region fallthrough
CT: control target
= control target key end

     0   :  { %9 = vsyncpa [#allocation3], 0  ;;  %s1469_s0 = inlined_call_operand.hbm [shape: f32[2,8,32], index: 0, kind: input, shape index: {}]   ;;  %s1470_s1 = inlined_call_operand.hbm [shape: f32[32,32], index: 1, kind: input, shape index: {}]   ;;  %s1471_s2 = inlined_call_operand.hbm [shape: f32[32,32], index: 2, kind: input, shape index: {}]   ;;  %s1472_s3 = inlined_call_operand.hbm [shape: f32[32,32], index: 3, kind: input, shape index: {}]   ;;  %s1473_s4 = inlined_call_operand.hbm [shape: f32[2,8,32], index: 4, kind: output, shape index: {}]  }
   0x1   :  { %11 = vsyncpa [#allocation3 + $0x1], 0 }
   0x2   :  { %12 = vsyncpa [#allocation6], 0 }
   0x3   :  { %13 = vsyncpa [#allocation9], 0 }
   0x4   :  { %14 = vsyncpa [#allocation4], 0 }
   0x5   :  { %16 = vsyncpa [#allocation4 + $0x1], 0  ;;  %s1188_s15 = smov 0   ;;  %s1190_s16 = smov 0  }
   0x6   :  { %s1192_s17 = smov 0   ;;  %s1194_s18 = smov 0  }
   0x7 LB: > { %s1209_s19 = sadd.s32 4294967295, %s1151_s18   ;;  %s771_s20 = sadd.s32 4294967294, %s1151_s18   ;;  %s1151_s18 = sphi %s1194_s18, %s1496_s18   ;;  %s1147_s17 = sphi %s1192_s17, %s1495_s17   ;;  %s1143_s16 = sphi %s1190_s16, %s1494_s16   ;;  %s1139_s15 = sphi %s1188_s15, %s1493_s15  }
   0x8   : > { %p42_p0 = scmp.ne.s32.totalorder %s1143_s16, %s1139_s15  ;;  %p1474_p1 = scmp.eq.s32.totalorder %s1209_s19, 0 }
   0x9   : > { %p135_p3 = scmp.eq.s32.totalorder %s771_s20, 1  ;;  %p772_p5 = scmp.ge.s32.totalorder %s1151_s18, 1 }
   0xa   : > { %p1218_p4 = por %p1474_p1, %p42_p0  ;;  %p142_p7 = scmp.lt.s32.totalorder %s1151_s18, 3 }
   0xb   : > { %p1223_p6 = por %p135_p3, %p42_p0  ;;  %s1153_s24 = smov [#allocation5]  }
   0xc   : > { %s1477_s21 = scalar_select %p1218_p4, 1, 0 }
   0xd   : > { %s1478_s22 = scalar_select %p1223_p6, 1, 0 }
   0xe   : > { %p1228_p8 = pnand %p772_p5, %p142_p7  ;;  %s154_s25 = sshll.u32 %s1153_s24, 4  ;;  %s1232_s25 = int_to_ptr.vmem [resolvable:$true] %s154_s25 }
   0xf   : > { %s1154_s27 = smov [#allocation7]   ;;  %s1155_s29 = smov [#allocation8]  }
  0x10   : > { %s1479_s23 = scalar_select %p1228_p8, 1, 0 }
  0x11   : > { %p891_p9 = pneg %p1228_p8  ;;  %s167_s28 = sshll.u32 %s1154_s27, 4  ;;  %s1243_s28 = int_to_ptr.vmem [resolvable:$true] %s167_s28 }
  0x12   : > { %s1245_s30 = sshll.u32 %s1155_s29, 4  ;;  %s963_s7 = scalar_lea.hbm %s1470_s1, 512  ;;  %s181_s30 = int_to_ptr.vmem [resolvable:$true] %s1245_s30 }
  0x13   : > { %p1239_p11 = pnand %p891_p9, %p1474_p1  ;;  %p964_p12 = scmp.ne.s32.totalorder %s1470_s1, %s963_s7 }
  0x14   : > { %p970_p5 = scmp.lt.u32.totalorder %s963_s7, %s1470_s1 }
  0x15   : > { %p1255_p13 = pneg %p1239_p11 }
  0x17   : > { %p966_p0 = pnand %p1255_p13, %p964_p12 }
  0x19   : > { %p967_p3 = pneg %p966_p0 }
  0x1b   : > { %p972_p7 = pnand %p970_p5, %p967_p3 }
  0x1d   : > { %975 = shalt.err (!%p972_p7)
}
  0x1e   : > { %s976_s13 = scalar_lea.vmem %s1232_s25, 512  ;;  %p984_p2 = scmp.lt.s32.totalorder %s1232_s25, %s1232_s25 }
  0x1f   : > { %p977_p9 = scmp.ne.s32.totalorder %s1232_s25, %s976_s13  ;;  %p985_p6 = scmp.lt.s32.totalorder %s976_s13, %s976_s13 }
  0x21   : > { %p979_p10 = pnand %p977_p9, %p1255_p13  ;;  %p986_p12 = por %p985_p6, %p984_p2 }
  0x23   : > { %p980_p1 = pneg %p979_p10 }
  0x25   : > { %p987_p0 = pnand %p986_p12, %p980_p1 }
  0x27   : > { %990 = shalt.err (!%p987_p0)
}
  0x28   : > { %s1156_s14 = smov 128   ;;  %s1157_s20 = smov 8  }
  0x29   : > { %894 = dma.hbm_to_vmem [thread:$0]  (!%p1239_p11), %s1470_s1, 512, %s1232_s25, [#allocation6], %s1156_s14, %s1156_s14, %s1157_s20  }
  0x2a   : > { %s991_s6 = scalar_lea.hbm %s1471_s2, 512 }
  0x2b   : > { %p992_p1 = scmp.ne.s32.totalorder %s1471_s2, %s991_s6  ;;  %p998_p10 = scmp.lt.u32.totalorder %s991_s6, %s1471_s2 }
  0x2d   : > { %p994_p2 = pnand %p992_p1, %p1255_p13 }
  0x2f   : > { %p995_p6 = pneg %p994_p2 }
  0x31   : > { %p1000_p3 = pnand %p998_p10, %p995_p6 }
  0x33   : > { %1003 = shalt.err (!%p1000_p3)
}
  0x34   : > { %s1004_s25 = scalar_lea.vmem %s1243_s28, 512  ;;  %p1012_p12 = scmp.lt.s32.totalorder %s1243_s28, %s1243_s28 }
  0x35   : > { %p1005_p5 = scmp.ne.s32.totalorder %s1243_s28, %s1004_s25  ;;  %p1013_p0 = scmp.lt.s32.totalorder %s1004_s25, %s1004_s25 }
  0x37   : > { %p1007_p7 = pnand %p1005_p5, %p1255_p13  ;;  %p1014_p1 = por %p1013_p0, %p1012_p12 }
  0x39   : > { %p1008_p9 = pneg %p1007_p7 }
  0x3b   : > { %p1015_p2 = pnand %p1014_p1, %p1008_p9 }
  0x3d   : > { %1018 = shalt.err (!%p1015_p2)
}
  0x3e   : > { %897 = dma.hbm_to_vmem [thread:$0]  (!%p1239_p11), %s1471_s2, 512, %s1243_s28, [#allocation6], %s1156_s14, %s1156_s14, %s1157_s20  }
  0x3f   : > { %s1019_s29 = scalar_lea.hbm %s1472_s3, 512 }
  0x40   : > { %p1020_p6 = scmp.ne.s32.totalorder %s1472_s3, %s1019_s29  ;;  %p1026_p5 = scmp.lt.u32.totalorder %s1019_s29, %s1472_s3 }
  0x42   : > { %p1022_p10 = pnand %p1020_p6, %p1255_p13 }
  0x44   : > { %p1023_p3 = pneg %p1022_p10 }
  0x46   : > { %p1028_p7 = pnand %p1026_p5, %p1023_p3 }
  0x48   : > { %1031 = shalt.err (!%p1028_p7)
}
  0x49   : > { %s1032_s9 = scalar_lea.vmem %s181_s30, 512  ;;  %p1040_p1 = scmp.lt.s32.totalorder %s181_s30, %s181_s30 }
  0x4a   : > { %p1033_p9 = scmp.ne.s32.totalorder %s181_s30, %s1032_s9  ;;  %p1041_p2 = scmp.lt.s32.totalorder %s1032_s9, %s1032_s9 }
  0x4c   : > { %p1035_p12 = pnand %p1033_p9, %p1255_p13  ;;  %p1042_p4 = por %p1041_p2, %p1040_p1 }
  0x4e   : > { %p1036_p0 = pneg %p1035_p12 }
  0x50   : > { %p1043_p8 = pnand %p1042_p4, %p1036_p0 }
  0x52   : > { %1046 = shalt.err (!%p1043_p8)
}
  0x53   : > { %900 = dma.hbm_to_vmem [thread:$0]  (!%p1239_p11), %s1472_s3, 512, %s181_s30, [#allocation9], %s1156_s14, %s1156_s14, %s1157_s20  }
  0x54   : > { %s1328_s10 = sadd.s32 1, %s1151_s18   ;;  %s29_s25 = sadd.s32 1, %s1147_s17 }
  0x55   : > { %s26_s26 = ssub.s32 %s1151_s18, %s1328_s10  ;;  %p36_p8 = scmp.ne.s32.totalorder %s1147_s17, %s1143_s16 }
  0x56   : > { %p27_p4 = scmp.eq.s32.totalorder %s26_s26, 0  ;;  %p37_p13 = scmp.eq.s32.totalorder %s1151_s18, 0 }
  0x57   : > { %p912_p6 = scmp.lt.s32.totalorder %s1151_s18, 2  ;;  %p1482_p3 = scmp.eq.s32.totalorder %s1209_s19, 1 }
  0x58   : > { %s1338_s12 = scalar_select %p27_p4, %s1147_s17, %s29_s25  }
  0x59   : > { %p38_p10 = por %p37_p13, %p36_p8  ;;  %p1342_p5 = por %p1482_p3, %p36_p8 }
  0x5a   : > { %s194_s24 = sand.u32 1, %s1147_s17   ;;  %s778_s27 = sshll.u32 %s1151_s18, 7 }
  0x5b   : > { %s777_s30 = sshll.u32 %s194_s24, 3  ;;  %s1351_s29 = scalar_lea.hbm %s1469_s0, %s778_s27 }
  0x5c   : > { %s198_s5 = scalar_lea.vmem [#allocation2], %s777_s30  ;;  %p1353_p11 = pnand %p912_p6, %p38_p10 }
  0x5d   : > { %s205_s6 = sshll.u32 %s198_s5, 4  ;;  %s195_s8 = scalar_lea.sflag [#allocation3], %s194_s24  ;;  %s1357_s6 = int_to_ptr.vmem [resolvable:$true] %s205_s6 }
  0x5e   : > { %s1047_s9 = scalar_lea.hbm %s1351_s29, 128  ;;  %p1049_p9 = pneg %p1353_p11 }
  0x5f   : > { %p1048_p7 = scmp.ne.s32.totalorder %s1351_s29, %s1047_s9  ;;  %s1052_s26 = scalar_lea.hbm %s1469_s0, 256 }
  0x60   : > { %p1053_p1 = scmp.lt.u32.totalorder %s1351_s29, %s1469_s0  ;;  %p1054_p2 = scmp.lt.u32.totalorder %s1052_s26, %s1047_s9 }
  0x61   : > { %p1050_p12 = pnand %p1049_p9, %p1048_p7  ;;  %p1056_p8 = scmp.lt.u32.totalorder %s1047_s9, %s1351_s29 }
  0x62   : > { %p1055_p4 = por %p1054_p2, %p1053_p1 }
  0x63   : > { %p1051_p0 = pneg %p1050_p12 }
  0x64   : > { %p1057_p13 = por %p1056_p8, %p1055_p4 }
  0x66   : > { %p1058_p6 = pnand %p1057_p13, %p1051_p0 }
  0x68   : > { %1061 = shalt.err (!%p1058_p6)
}
  0x69   : > { %s1062_s24 = scalar_lea.vmem %s1357_s6, 128  ;;  %s1158_s30 = smov [#allocation2]  }
  0x6a   : > { %p1063_p10 = scmp.ne.s32.totalorder %s1357_s6, %s1062_s24  ;;  %s1067_s14 = sshll.u32 %s1158_s30, 4  ;;  %s1068_s14 = int_to_ptr.vmem [resolvable:$false] %s1067_s14 }
  0x6b   : > { %s1069_s20 = scalar_lea.vmem %s1068_s14, 256  ;;  %p1070_p12 = scmp.lt.s32.totalorder %s1357_s6, %s1068_s14 }
  0x6c   : > { %p1065_p3 = pnand %p1063_p10, %p1049_p9  ;;  %p1071_p1 = scmp.lt.s32.totalorder %s1069_s20, %s1062_s24 }
  0x6e   : > { %p1066_p7 = pneg %p1065_p3  ;;  %p1072_p2 = por %p1071_p1, %p1070_p12 }
  0x70   : > { %p1073_p4 = pnand %p1072_p2, %p1066_p7 }
  0x72   : > { %1076 = shalt.err (!%p1073_p4)
}
  0x73   : > { %904 = dma.hbm_to_vmem [thread:$0]  (!%p1353_p11), %s1351_s29, 128, %s1357_s6, %s195_s8  }
  0x74   : > { %p1485_p0 = scmp.ne.s32.totalorder %s1479_s23, 0 }
  0x75   : > { %s1387_s5 = sand.u32 (!%p1485_p0), 1, %s1143_s16   ;;  %p1486_p9 = scmp.ne.s32.totalorder (!%p1485_p0), %s1477_s21, 0 }
  0x76   : > { %214 = sbr.rel (%p1485_p0) target bundleno = 960 (0x3c0), region = 36  ;;  %s780_s9 = sshll.u32 (!%p1485_p0), %s1387_s5, 3 }
  0x77   : > { %s217_s28 = scalar_lea.sflag (!%p1485_p0), [#allocation3], %s1387_s5  ;;  %s1393_s11 = scalar_lea.vmem (!%p1485_p0), [#allocation2], %s780_s9 }
  0x7d   : > { %1122 = dma.done.wait (%p1486_p9), %s217_s28, 128  }
  0x7e   : > { %1124 = vsyncadd (%p1486_p9), %s217_s28, 4294967168  ;;  %p1487_p11 = scmp.eq.s32.totalorder %s1209_s19, 0 }
  0x80   : > { %1126 = dma.done.wait (%p1487_p11), [#allocation6], 1024   ;;  %p1488_p8 = pmov %p1487_p11 }
  0x82   : > { %1128 = vsyncadd (%p1488_p8), [#allocation6], 4294966272  ;;  %p1489_p13 = pmov %p1488_p8 }
  0x83   : > { %p1490_p6 = pmov %p1488_p8 }
  0x84   : > { %1130 = dma.done.wait (%p1489_p13), [#allocation9], 512  }
  0x85   : > { %1132 = vsyncadd (%p1490_p6), [#allocation9], 4294966784  ;;  %v1159_v0 = vmov 0.0|0.0   ;;  %vm1160_vm0 = vmmov 0   ;;  %v1161_v1 = vmov 0.0   ;;  %v262_v2 = vld [vmem:[#allocation7] sm:$0xff]  ;;  %v484_v25 = vlaneseq }
  0x86   : > { %863 = vmatprep.subr.bf16.mxu1 %v1159_v0  ;;  %857 = vmatprep.subr.bf16.mxu0 %v1159_v0  ;;  %v263_v3 = vld [vmem:[#allocation7 + $0x8] sm:$0xff]  ;;  %v258_v4 = vld [vmem:[#allocation5] sm:$0xff]  ;;  %v264_v7 = vld [vmem:[#allocation7 + $0x10] sm:$0xff]  ;;  %vm270_vm1 = vcmask 261120   ;;  %vm566_vm3 = vcmask 64512   ;;  %s792_s21 = sshll.u32 %s1209_s19, 7 }
  0x87   : > { %833 = vmatprep.mubr.msk.f32.mxu1 %vm1160_vm0, %v1161_v1  ;;  %822 = vmatprep.mubr.msk.f32.mxu0 %vm1160_vm0, %v1161_v1  ;;  %v864_v5 = vpack.c.bf16 %v263_v3, %v262_v2  ;;  %v259_v6 = vld [vmem:[#allocation5 + $0x8] sm:$0xff]  ;;  %v265_v8 = vld [vmem:[#allocation7 + $0x18] sm:$0xff]  ;;  %v260_v10 = vld [vmem:[#allocation5 + $0x10] sm:$0xff]  ;;  %v485_v26 = vshrl.u32 %v484_v25, 7  ;;  %v487_v27 = vand.u32 127, %v484_v25  ;;  %s256_s23 = scalar_lea.vmem [#allocation10], %s780_s9  ;;  %s1424_s8 = scalar_lea.hbm %s1473_s4, %s792_s21 }
  0x88   : > { %v858_v9 = vpack.c.bf16 %v259_v6, %v258_v4  ;;  %v261_v11 = vld [vmem:[#allocation5 + $0x18] sm:$0xff]  ;;  %v867_v12 = vpack.c.bf16 %v265_v8, %v264_v7  ;;  %v266_v15 = vld [vmem:[#allocation8] sm:$0xff]  ;;  %v267_v16 = vld [vmem:[#allocation8 + $0x8] sm:$0xff]  ;;  %s672_s29 = sshll.u32 %s256_s23, 4  ;;  %s659_s19 = scalar_lea.sflag [#allocation4], %s1387_s5  ;;  %s1426_s29 = int_to_ptr.vmem [resolvable:$true] %s672_s29 }
  0x89   : > { %865 = vmatpush3.bf16.msra.mxu1 %v864_v5  ;;  %v861_v13 = vpack.c.bf16 %v261_v11, %v260_v10  ;;  %v257_v14 = vld [vmem:[%s1393_s11] sm:$0xff]  ;;  %v870_v18 = vpack.c.bf16 %v267_v16, %v266_v15  ;;  %vm488_vm2 = vcmp.gt.s32.totalorder %v487_v27, %v485_v26  ;;  %s1077_s26 = scalar_lea.vmem %s1426_s29, 128  ;;  %s1162_s25 = smov [#allocation10]  }
  0x8a   : > { %859 = vmatpush3.bf16.msra.mxu0 %v858_v9  ;;  %866 = vmatprep.subr.bf16.mxu1 %v1159_v0  ;;  %v268_v17 = vld [vmem:[#allocation8 + $0x10] sm:$0xff]  ;;  %v269_v19 = vld [vmem:[#allocation8 + $0x18] sm:$0xff]  ;;  %p1078_p10 = scmp.ne.s32.totalorder %s1426_s29, %s1077_s26  ;;  %s1081_s27 = sshll.u32 %s1162_s25, 4  ;;  %s1082_s27 = int_to_ptr.vmem [resolvable:$false] %s1081_s27 }
  0x8b   : > { %860 = vmatprep.subr.bf16.mxu0 %v1159_v0  ;;  %v873_v20 = vpack.c.bf16 %v269_v19, %v268_v17  ;;  %s1083_s24 = scalar_lea.vmem %s1082_s27, 256  ;;  %p1084_p12 = scmp.lt.s32.totalorder %s1426_s29, %s1082_s27 }
  0x8c   : > { %p1079_p3 = pnand %p1078_p10, %p1342_p5  ;;  %p1085_p1 = scmp.lt.s32.totalorder %s1083_s24, %s1077_s26 }
  0x8d   : > { %868 = vmatpush3.bf16.msra.mxu1 %v867_v12 }
  0x8e   : > { %862 = vmatpush3.bf16.msra.mxu0 %v861_v13  ;;  %847 = vmatprep.subr.mxu1 %v1161_v1  ;;  %p1080_p7 = pneg %p1079_p3  ;;  %p1086_p2 = por %p1085_p1, %p1084_p12 }
  0x8f   : > { %869 = vmatprep.subr.bf16.mxu0 %v1159_v0 }
  0x90   : > { %834 = vmatmul.mubr.msk.f32.vlgmr.msra.gmra.mrb[0].mxu1 %vm270_vm1, %v257_v14  ;;  %p1087_p4 = pnand %p1086_p2, %p1080_p7 }
  0x91   : > { %823 = vmatmul.mubr.msk.f32.vlgmr.msra.gmra.mrb[0].mxu0 %vm270_vm1, %v257_v14  ;;  %849 = vmatprep.mubr.msk.f32.mxu1 %vm1160_vm0, %v1161_v1 }
  0x92   : > { %844 = vmatprep.mubr.msk.f32.mxu0 %vm1160_vm0, %v1161_v1  ;;  %871 = vmatpush3.bf16.msra.mxu0 %v870_v18 }
  0x93   : > { %872 = vmatprep.subr.bf16.mxu0 %v1159_v0 }
  0x96   : > { %874 = vmatpush3.bf16.msra.mxu0 %v873_v20 }
  0x99   : > { %845 = vmatmul.mubr.msk.f32.vlgmr.msra.gmra.mrb[2].mxu0 %vm270_vm1, %v257_v14 }
 0x163   : > { %v410_v21 = vpop.f32.mrb[0].mxu1 }
 0x164   : > { %v835_v22 = vpop.f32.mrb[1].mxu1  ;;  %848 = vmatpush3.xpose.msk.msra.mxu1 %vm270_vm1, %v410_v21  ;;  %v340_v23 = vpop.f32.mrb[0].mxu0 }
 0x165   : > { %v824_v24 = vpop.f32.mrb[1].mxu0  ;;  %852 = vmatprep.subr.mxu1 %v1161_v1 }
 0x167   : > { %850 = vmatmul.mubr.msk.f32.vlgmr.msra.gmra.mrb[2].mxu1 %vm270_vm1, %v340_v23 }
 0x168   : > { %854 = vmatprep.mubr.msk.f32.mxu1 %vm1160_vm0, %v1161_v1 }
 0x16c   : > { %v480_v32 = vpop.f32.mrb[2].mxu0 }
 0x16d   : > { %v846_v33 = vpop.f32.mrb[3].mxu0  ;;  %853 = vmatpush3.msra.mxu1 %v480_v32 }
 0x23a   : > { %v561_v28 = vpop.f32.mrb[2].mxu1 }
 0x23b   : > { %v565_v29 = vsel %vm488_vm2, -inf, %v561_v28  ;;  %v851_v30 = vpop.f32.mrb[3].mxu1 }
 0x23c   : > { %v567_v31 = vsel %vm566_vm3, %v565_v29, -inf }
 0x23d   : > { %568 = vmax.xlane.f32.xlu0 %v567_v31 }
 0x2ca   : > { %v569_v34 = vpop.xlane.xlu0 %568 }
 0x2cb   : > { %v573_v35 = vsub.f32 %v565_v29, %v569_v34  ;;  %v570_v39 = vsub.f32 -inf, %v569_v34 }
 0x2cd   : > { %v574_v36 = vmul.f32 1.442695, %v573_v35  ;;  %v571_v40 = vmul.f32 1.442695, %v570_v39 }
 0x2cf   : > { %957 = vpow2.f32 %v574_v36 }
 0x2d0   : > { %959 = vpow2.f32 %v571_v40 }
 0x2d9   : > { %v958_v37 = vpop.eup %957 }
 0x2da   : > { %855 = vmatmul.mubr.msk.f32.vlgmr.msra.gmra.mrb[4].mxu1 %vm566_vm3, %v958_v37  ;;  %v577_v38 = vsel %vm566_vm3, %v958_v37, 0.0  ;;  %v960_v41 = vpop.eup %959 }
 0x2db   : > { %578 = vadd.xlane.f32.xlu0 %v577_v38  ;;  %v576_v43 = vmul.f32 0.0, %v960_v41 }
 0x368   : > { %v579_v42 = vpop.xlane.xlu0 %578 }
 0x369   : > { %v580_v44 = vadd.f32 %v579_v42, %v576_v43 }
 0x36b   : > { %961 = vrcp.f32 %v580_v44 }
 0x375   : > { %v962_v48 = vpop.eup %961 }
 0x3ad   : > { %v650_v45 = vpop.f32.mrb[4].mxu1 }
 0x3ae   : > { %v654_v46 = vadd.f32 %v650_v45, %v576_v43  ;;  %v856_v47 = vpop.f32.mrb[5].mxu1 }
 0x3b0   : > { %v656_v49 = vmul.f32 %v962_v48, %v654_v46 }
 0x3b2   : > { %657 = vst.msk [vmem:[%s256_s23] sm:$0xff] %vm270_vm1, %v656_v49 }
 0x3b3   : > { %1090 = shalt.err (!%p1087_p4)
}
 0x3b4   : > { %s1091_s30 = scalar_lea.hbm %s1424_s8, 128  ;;  %s1095_s5 = scalar_lea.hbm %s1473_s4, 256 }
 0x3b5   : > { %p1092_p0 = scmp.ne.s32.totalorder %s1424_s8, %s1091_s30  ;;  %p1096_p8 = scmp.lt.u32.totalorder %s1424_s8, %s1473_s4 }
 0x3b6   : > { %p1097_p13 = scmp.lt.u32.totalorder %s1095_s5, %s1091_s30  ;;  %p1099_p10 = scmp.lt.u32.totalorder %s1091_s30, %s1424_s8 }
 0x3b7   : > { %p1093_p9 = pnand %p1092_p0, %p1342_p5 }
 0x3b8   : > { %p1098_p6 = por %p1097_p13, %p1096_p8 }
 0x3b9   : > { %p1094_p11 = pneg %p1093_p9 }
 0x3ba   : > { %p1100_p3 = por %p1099_p10, %p1098_p6 }
 0x3bc   : > { %p1101_p7 = pnand %p1100_p3, %p1094_p11 }
 0x3be   : > { %1104 = shalt.err (!%p1101_p7)
}
 0x3bf   : > { %889 = dma.vmem_to_hbm [thread:$0]  (%p1342_p5), %s1426_s29, 128, %s1424_s8, %s659_s19  }
 0x3c0 PF: > { %s684_s11 = sand.u32 1, %s1139_s15   ;;  %p1491_p12 = scmp.ne.s32.totalorder %s1478_s22, 0 }
 0x3c1   : > { %p1492_p1 = scmp.ge.s32.totalorder %s1151_s18, 2  ;;  %s685_s21 = scalar_lea.sflag [#allocation4], %s684_s11 }
 0x3c3   : > { %p906_p2 = pnand %p1492_p1, %p1491_p12 }
 0x3c5   : > { %1134 = dma.done.wait (!%p906_p2), %s685_s21, 128  }
 0x3c6   : > { %1136 = vsyncadd (!%p906_p2), %s685_s21, 4294967168  ;;  %p19_p4 = scmp.ge.s32.totalorder %s1328_s10, 4   ;;  %s1493_s15 = smov %s1143_s16 }
 0x3c7   : > { %s1494_s16 = smov %s1147_s17  ;;  %s1495_s17 = smov %s1338_s12 }
 0x3c8   : > { %s1496_s18 = smov %s1328_s10  ;;  %21 = sbr.rel (!%p19_p4) target bundleno = 7 (0x7), region = 93 }
 0x3cf   :  { %690 = vsyncpa [#allocation3], 1 }
 0x3d0   :  { %692 = vsyncpa [#allocation3 + $0x1], 1 }
 0x3d1   :  { %693 = vsyncpa [#allocation6], 1 }
 0x3d2   :  { %694 = vsyncpa [#allocation9], 1 }
 0x3d3   :  { %695 = vsyncpa [#allocation4], 1 }
 0x3d4   :  { %697 = vsyncpa [#allocation4 + $0x1], 1 }

</bundles_post_ra>
